<compile_context>
chip_gen: v5e
topology: v5e:2x2
jax: 0.10.0
libtpu: 0.0.40
codegen_flags: <defaults>
</compile_context>

<pallas_src>
import jax
import jax.numpy as jnp
from jax.experimental import pallas as pl
from jax.experimental.pallas import tpu as pltpu


# ---------------------------------------------------------------------------
# Kernels
# ---------------------------------------------------------------------------
def _identity_tile_kernel(x_ref, o_ref):
    # Straight VMEM tile copy (auto-pipelined by BlockSpec).
    o_ref[...] = x_ref[...]


def _identity_hbm_copy_kernel(x_hbm, o_hbm, sem):
    # Single whole-array HBM->HBM DMA; no VMEM staging, no (8,128) constraint.
    cp = pltpu.make_async_copy(x_hbm, o_hbm, sem)
    cp.start()
    cp.wait()


# ---------------------------------------------------------------------------
# Forward
# ---------------------------------------------------------------------------
def _tiled_identity(flat, total, dtype):
    """Lane-dense tiled copy for sizes divisible by 128."""
    itemsize = jnp.dtype(dtype).itemsize

    # Lane-dense layout: last dim is the largest "nice" multiple of 128 that
    # divides the element count exactly (no padding).
    lanes = 128
    for cand in (4096, 2048, 1024, 512, 256, 128):
        if total % cand == 0:
            lanes = cand
            break
    rows = total // lanes

    # Packed-sublane multiple for the blocked (second-minor) dim.
    sub = {4: 8, 2: 16, 1: 32}.get(itemsize, 8)

    # ~4 MiB blocks: 4x (in+out, double-buffered) stays well under every
    # generation's VMEM budget (incl. v7x's 64 MiB physical / 32 MiB scoped).
    target_block_bytes = 4 * 1024 * 1024
    max_rows = max(sub, (target_block_bytes // (lanes * itemsize)) // sub * sub)

    if rows <= max_rows:
        # Single full-extent block (full array dims are exempt from (8,128)).
        tile_m = rows
    else:
        # Aligned tile; Pallas masks the ragged last block if rows % tile_m != 0.
        tile_m = max_rows

    grid_m = pl.cdiv(rows, tile_m)
    x2 = flat.reshape(rows, lanes)

    out2 = pl.pallas_call(
        _identity_tile_kernel,
        out_shape=jax.ShapeDtypeStruct((rows, lanes), dtype),
        grid=(grid_m,),
        in_specs=[pl.BlockSpec((tile_m, lanes), lambda i: (i, 0))],
        out_specs=pl.BlockSpec((tile_m, lanes), lambda i: (i, 0)),
        compiler_params=pltpu.CompilerParams(
            dimension_semantics=("parallel",),
            vmem_limit_bytes=32 * 1024 * 1024),
    )(x2)
    return out2.reshape(-1)


def _hbm_identity(flat, total, dtype):
    """Whole-array HBM->HBM DMA for awkward (non-128-aligned) sizes."""
    return pl.pallas_call(
        _identity_hbm_copy_kernel,
        out_shape=jax.ShapeDtypeStruct((total,), dtype),
        in_specs=[pl.BlockSpec(memory_space=pl.ANY)],
        out_specs=pl.BlockSpec(memory_space=pl.ANY),
        scratch_shapes=[pltpu.SemaphoreType.DMA(())],
    )(flat)


@jax.jit
def _forward_impl(x):
    orig_shape = x.shape
    dtype = x.dtype
    total = int(x.size)
    if total == 0:
        return x

    flat = x.reshape(-1)
    if total % 128 == 0:
        out_flat = _tiled_identity(flat, total, dtype)
    else:
        out_flat = _hbm_identity(flat, total, dtype)
    return out_flat.reshape(orig_shape)


def placeholder_model_forward(x: jnp.ndarray,
                              param_a=None,
                              param_b=None) -> jnp.ndarray:
    """Identity forward, matching PlaceholderModel.forward(x) -> x.

    param_a / param_b are stored but unused by the reference module.
    Note: the mathematically optimal implementation is simply `return x`;
    the pallas_call is retained only because a kernel is required here.
    """
    del param_a, param_b
    return _forward_impl(x)


if __name__ == "__main__":
    key = jax.random.PRNGKey(0)
    # Deterministic example input consistent with an NCHW conv-style module.
    x = jax.random.normal(key, (2, 4, 16, 16), dtype=jnp.float32)

    y = placeholder_model_forward(x, param_a=1, param_b=2)
    y = jax.block_until_ready(y)

    assert y.shape == x.shape and y.dtype == x.dtype
    assert bool(jnp.all(y == x))
    print("KERNEL_OK")
</pallas_src>

<mosaic_0001>
module attributes {stable_mosaic.version = 11 : i64} {
  func.func @_identity_tile_kernel(%arg0: i32, %arg1: memref<1x2048xf32, #tpu.memory_space<vmem>>, %arg2: memref<1x2048xf32, #tpu.memory_space<vmem>>) attributes {dimension_semantics = [#tpu.dimension_semantics<parallel>], iteration_bounds = array<i64: 1>, scalar_prefetch = 0 : i64, scratch_operands = 0 : i64, tpu.core_type = #tpu.core_type<tc>, window_params = [{transform_indices = @transform_0, window_bounds = array<i64: 1, 2048>}, {transform_indices = @transform_1, window_bounds = array<i64: 1, 2048>}]} {
    %c0 = arith.constant 0 : index
    %c0_0 = arith.constant 0 : index
    %0 = vector.load %arg1[%c0, %c0_0] : memref<1x2048xf32, #tpu.memory_space<vmem>>, vector<1x2048xf32>
    %c0_1 = arith.constant 0 : index
    %c0_2 = arith.constant 0 : index
    %1 = vector.load %arg2[%c0_1, %c0_2] : memref<1x2048xf32, #tpu.memory_space<vmem>>, vector<1x2048xf32>
    tpu.vector_store %arg2[%c0_1, %c0_2], %0 {strides = array<i32>} : memref<1x2048xf32, #tpu.memory_space<vmem>>, vector<1x2048xf32>,
    return
  }
  func.func @transform_0(%arg0: i32) -> (i32, i32) {
    %c0_i32 = arith.constant 0 : i32
    %c0_i32_0 = arith.constant 0 : i32
    return %arg0, %c0_i32 : i32, i32
  }
  func.func @transform_1(%arg0: i32) -> (i32, i32) {
    %c0_i32 = arith.constant 0 : i32
    %c0_i32_0 = arith.constant 0 : i32
    return %arg0, %c0_i32 : i32, i32
  }
}

</mosaic_0001>

<bundles_post_ra>
// kernel: _forward_impl.1
= control target key start
LH: loop header
LB: loop body
LE: loop exit
PB: predicated region body
PF: predicated region fallthrough
CT: control target
= control target key end

     0   :  { %s38_s0 = inlined_call_operand.vmem [shape: f32[1,2048], index: 0, kind: input, shape index: {}]   ;;  %s39_s1 = inlined_call_operand.vmem [shape: f32[1,2048], index: 1, kind: output, shape index: {}]  }
   0x1   :  { %v8_v0 = vld [vmem:[%s38_s0] sm:$0xff]  ;;  %v9_v1 = vld [vmem:[%s38_s0 + $0x8] sm:$0xff] }
   0x2   :  { %10 = vst [vmem:[%s39_s1] sm:$0xff] %v8_v0 }
   0x3   :  { %11 = vst [vmem:[%s39_s1 + $0x8] sm:$0xff] %v9_v1 }

</bundles_post_ra>
